<compile_context>
chip_gen: v5e
topology: v5e:2x2
jax: 0.10.0
libtpu: 0.0.40
codegen_flags: <defaults>
</compile_context>

<pallas_src>
import functools

import jax
import jax.numpy as jnp
from jax import lax
from jax.experimental import pallas as pl
from jax.experimental.pallas import tpu as pltpu


def _round_up(x, m):
    return ((x + m - 1) // m) * m


def _joint_embedding_kernel(x_ref, w_ref, b_ref, o_ref):
    # x_ref: (K, TILE_T) bf16   -- activations in the original (B, K, T) layout
    # w_ref: (K, NH_pad) bf16   -- Linear weight transposed, columns padded to mult of 128
    # b_ref: (1, NH_pad) f32
    # o_ref: (TILE_T, NH_pad) f32, lane-dense
    acc = lax.dot_general(
        x_ref[...],
        w_ref[...],
        dimension_numbers=(((0,), (0,)), ((), ())),  # contract K = dim 0 of both
        preferred_element_type=jnp.float32,
    )  # (TILE_T, NH_pad) f32
    o_ref[...] = (acc + b_ref[...]).astype(o_ref.dtype)


@functools.partial(jax.jit, static_argnames=("out_features", "tile_t"))
def joint_embedding_forward(inputs, weight_t, bias_2d, *, out_features=None, tile_t=256):
    """inputs: (B, N*M, T) float32 (same layout the PyTorch module receives)
       weight_t: (N*M, NH_pad) bfloat16  -- nn.Linear weight transposed, lane-padded
       bias_2d:  (1, NH_pad) float32      -- lane-padded
       out_features: true N*H (padding sliced off the result)
       returns: (B, T, N*H) float32
    """
    B, K, T = inputs.shape
    NH_pad = weight_t.shape[1]
    if out_features is None:
        out_features = NH_pad
    assert weight_t.shape[0] == K
    assert NH_pad % 128 == 0, "pad weight columns to a multiple of 128 (see init_params)"

    # Pick the T tile: large (multiple of 128) to fill the MXU M dim and amortize the
    # ~0.35us/step grid overhead; if T itself is small, use the (8-aligned) full T.
    if T <= tile_t:
        t_blk = _round_up(T, 8)
    else:
        t_blk = _round_up(tile_t, 128)
    T_pad = _round_up(T, t_blk)

    x = inputs
    if T_pad != T:
        x = jnp.pad(x, ((0, 0), (0, 0), (0, T_pad - T)))

    # bf16 operands: halve HBM bytes for x/w and run the MXU at native bf16 rate;
    # accumulation stays f32. (In a full model this cast fuses into the upstream
    # producer instead of being a standalone convert.)
    x = x.astype(jnp.bfloat16)

    num_t = pl.cdiv(T_pad, t_blk)
    grid = (B, num_t)

    out = pl.pallas_call(
        _joint_embedding_kernel,
        out_shape=jax.ShapeDtypeStruct((B, T_pad, NH_pad), jnp.float32),
        grid_spec=pltpu.PrefetchScalarGridSpec(
            num_scalar_prefetch=0,
            grid=grid,
            in_specs=[
                # Activations read directly in (B, K, T) layout -> no wrapper transpose.
                pl.BlockSpec((None, K, t_blk), lambda b, t: (b, 0, t)),
                # Weight & bias: constant blocks, resident across the whole grid.
                # TODO(synk): for large NH, drop the redundant double-buffer with
                # pipeline_mode=pl.Buffered(1) (or tile NH on a 3rd grid axis);
                # negligible at these sizes (~36 KiB weight).
                pl.BlockSpec((K, NH_pad), lambda b, t: (0, 0)),
                pl.BlockSpec((1, NH_pad), lambda b, t: (0, 0)),
            ],
            out_specs=pl.BlockSpec((None, t_blk, NH_pad), lambda b, t: (b, t, 0)),
        ),
        compiler_params=pltpu.CompilerParams(
            dimension_semantics=("parallel", "parallel"),
        ),
    )(x, weight_t, bias_2d)

    # Slice off T / NH padding (no-op when none was added).
    return out[:, :T, :out_features]


def init_params(key, num_joints, embedding_size, joint_vec_size=9):
    """nn.Linear default init: U(-1/sqrt(fan_in), +1/sqrt(fan_in)).

    Returns (weight_t, bias_2d, out_features):
      weight_t: (in_features, NH_pad) bfloat16, columns zero-padded to a multiple
                of 128 so kernel output stores stay lane-dense,
      bias_2d:  (1, NH_pad) float32, zero-padded the same way,
      out_features: the true N*H, used to slice padding off the kernel output.
    """
    in_features = num_joints * joint_vec_size
    out_features = num_joints * embedding_size
    nh_pad = _round_up(out_features, 128)

    k_w, k_b = jax.random.split(key)
    bound = 1.0 / jnp.sqrt(jnp.float32(in_features))
    # PyTorch stores weight as (out, in); keep the transposed (in, out) for the kernel.
    weight = jax.random.uniform(
        k_w, (out_features, in_features), jnp.float32, -bound, bound
    )
    bias = jax.random.uniform(k_b, (out_features,), jnp.float32, -bound, bound)

    weight_t = jnp.zeros((in_features, nh_pad), jnp.float32)
    weight_t = weight_t.at[:, :out_features].set(weight.T)
    bias_2d = jnp.zeros((1, nh_pad), jnp.float32).at[:, :out_features].set(bias)
    return weight_t.astype(jnp.bfloat16), bias_2d, out_features


if __name__ == "__main__":
    # Small, module-consistent shapes.
    B = 2                # batch
    T = 8                # sequence length
    num_joints = 8       # N
    joint_vec_size = 9   # M (flattened 3x3 rotation matrix)
    embedding_size = 16  # H
    K = num_joints * joint_vec_size      # 72
    NH = num_joints * embedding_size     # 128

    key = jax.random.PRNGKey(0)
    k_x, k_p = jax.random.split(key)

    inputs = jax.random.normal(k_x, (B, K, T), dtype=jnp.float32)  # (B, N*M, T)
    weight_t, bias_2d, out_features = init_params(
        k_p, num_joints, embedding_size, joint_vec_size
    )

    out = joint_embedding_forward(inputs, weight_t, bias_2d, out_features=out_features)
    out = jax.block_until_ready(out)

    # Reference (plain JAX) with the same bf16 operand quantization, f32 math.
    x_btk = jnp.transpose(inputs, (0, 2, 1)).astype(jnp.bfloat16).astype(jnp.float32)
    w_f32 = weight_t.astype(jnp.float32)[:, :out_features]
    ref = jnp.einsum("btk,kh->bth", x_btk, w_f32) + bias_2d[0, :out_features]

    assert out.shape == (B, T, NH), out.shape
    assert jnp.allclose(out, ref, atol=2e-3, rtol=2e-3), float(
        jnp.max(jnp.abs(out - ref))
    )

    print("KERNEL_OK")
</pallas_src>

<mosaic_0001>
module attributes {stable_mosaic.version = 11 : i64} {
  func.func @_joint_embedding_kernel(%arg0: i32, %arg1: i32, %arg2: memref<1x72x8xbf16, #tpu.memory_space<vmem>>, %arg3: memref<72x128xbf16, #tpu.memory_space<vmem>>, %arg4: memref<1x128xf32, #tpu.memory_space<vmem>>, %arg5: memref<1x8x128xf32, #tpu.memory_space<vmem>>) attributes {dimension_semantics = [#tpu.dimension_semantics<parallel>, #tpu.dimension_semantics<parallel>], iteration_bounds = array<i64: 2, 1>, scalar_prefetch = 0 : i64, scratch_operands = 0 : i64, tpu.core_type = #tpu.core_type<tc>, window_params = [{transform_indices = @transform_0, window_bounds = array<i64: 1, 72, 8>}, {pipeline_mode = #tpu.pipeline_mode<synchronous>, transform_indices = @transform_1, window_bounds = array<i64: 72, 128>}, {pipeline_mode = #tpu.pipeline_mode<synchronous>, transform_indices = @transform_2, window_bounds = array<i64: 1, 128>}, {transform_indices = @transform_3, window_bounds = array<i64: 1, 8, 128>}]} {
    %c0 = arith.constant 0 : index
    %c0_0 = arith.constant 0 : index
    %c0_1 = arith.constant 0 : index
    %0 = vector.load %arg2[%c0, %c0_0, %c0_1] : memref<1x72x8xbf16, #tpu.memory_space<vmem>>, vector<1x72x8xbf16>
    %1 = vector.shape_cast %0 : vector<1x72x8xbf16> to vector<72x8xbf16>
    %c0_2 = arith.constant 0 : index
    %c0_3 = arith.constant 0 : index
    %2 = vector.load %arg3[%c0_2, %c0_3] : memref<72x128xbf16, #tpu.memory_space<vmem>>, vector<72x128xbf16>
    %cst = arith.constant dense<0.000000e+00> : vector<8x128xf32>
    %3 = tpu.matmul %1, %2, %cst {dimension_numbers = #tpu.dot_dimension_numbers<[0], [0], [1], [1], [0, 1, 1, 1], [], []>} : vector<72x8xbf16>, vector<72x128xbf16>, vector<8x128xf32> -> vector<8x128xf32>
    %c0_4 = arith.constant 0 : index
    %c0_5 = arith.constant 0 : index
    %4 = vector.load %arg4[%c0_4, %c0_5] : memref<1x128xf32, #tpu.memory_space<vmem>>, vector<1x128xf32>
    %5 = vector.broadcast %4 : vector<1x128xf32> to vector<8x128xf32>
    %6 = arith.addf %3, %5 : vector<8x128xf32>
    %c0_6 = arith.constant 0 : index
    %c0_7 = arith.constant 0 : index
    %c0_8 = arith.constant 0 : index
    %7 = vector.load %arg5[%c0_6, %c0_7, %c0_8] : memref<1x8x128xf32, #tpu.memory_space<vmem>>, vector<1x8x128xf32>
    %8 = vector.shape_cast %7 : vector<1x8x128xf32> to vector<8x128xf32>
    %9 = vector.shape_cast %6 : vector<8x128xf32> to vector<1x8x128xf32>
    tpu.vector_store %arg5[%c0_6, %c0_7, %c0_8], %9 {strides = array<i32>} : memref<1x8x128xf32, #tpu.memory_space<vmem>>, vector<1x8x128xf32>,
    return
  }
  func.func @transform_0(%arg0: i32, %arg1: i32) -> (i32, i32, i32) {
    %c0_i32 = arith.constant 0 : i32
    %c0_i32_0 = arith.constant 0 : i32
    return %arg0, %c0_i32, %arg1 : i32, i32, i32
  }
  func.func @transform_1(%arg0: i32, %arg1: i32) -> (i32, i32) {
    %c0_i32 = arith.constant 0 : i32
    %c0_i32_0 = arith.constant 0 : i32
    %c0_i32_1 = arith.constant 0 : i32
    return %c0_i32, %c0_i32_0 : i32, i32
  }
  func.func @transform_2(%arg0: i32, %arg1: i32) -> (i32, i32) {
    %c0_i32 = arith.constant 0 : i32
    %c0_i32_0 = arith.constant 0 : i32
    %c0_i32_1 = arith.constant 0 : i32
    return %c0_i32, %c0_i32_0 : i32, i32
  }
  func.func @transform_3(%arg0: i32, %arg1: i32) -> (i32, i32, i32) {
    %c0_i32 = arith.constant 0 : i32
    %c0_i32_0 = arith.constant 0 : i32
    return %arg0, %arg1, %c0_i32 : i32, i32, i32
  }
}

</mosaic_0001>

<bundles_post_ra>
// kernel: joint_embedding_forward.1
= control target key start
LH: loop header
LB: loop body
LE: loop exit
PB: predicated region body
PF: predicated region fallthrough
CT: control target
= control target key end

     0   :  { %8 = vsyncpa [#allocation3], 0  ;;  %s726_s0 = inlined_call_operand.vmem [shape: bf16[2,72,8], index: 0, kind: input, shape index: {}]   ;;  %s727_s1 = inlined_call_operand.vmem [shape: bf16[72,128], index: 1, kind: input, shape index: {}]   ;;  %s728_s2 = inlined_call_operand.vmem [shape: f32[1,128], index: 2, kind: input, shape index: {}]   ;;  %s729_s3 = inlined_call_operand.hbm [shape: f32[2,8,128], index: 3, kind: output, shape index: {}]  }
   0x1   :  { %10 = vsyncpa [#allocation3 + $0x1], 0  ;;  %s611_s12 = smov 0   ;;  %s613_s13 = smov 0  }
   0x2   :  { %s615_s14 = smov 0   ;;  %s617_s15 = smov 0  }
   0x3   :  { %s619_s16 = smov 0   ;;  %s621_s17 = smov 0  }
   0x4 LB: > { %s401_s18 = sadd.s32 4294967295, %s589_s17   ;;  %s402_s19 = sadd.s32 4294967294, %s589_s17   ;;  %s589_s17 = sphi %s621_s17, %s16_s17   ;;  %s585_s16 = sphi %s619_s16, %s736_s16   ;;  %s581_s15 = sphi %s617_s15, %s735_s15   ;;  %s577_s14 = sphi %s615_s14, %s734_s14   ;;  %s573_s13 = sphi %s613_s13, %s733_s13   ;;  %s569_s12 = sphi %s611_s12, %s732_s12  }
   0x5   : > { %s28_s20 = sadd.s32 1, %s585_s16  ;;  %s107_s21 = sadd.s32 1, %s577_s14 }
   0x6   : > { %p30_p0 = scmp.ge.s32.totalorder %s28_s20, 2  ;;  %p117_p1 = scmp.ne.s32.totalorder %s577_s14, %s573_s13 }
   0x7   : > { %p118_p2 = scmp.eq.s32.totalorder %s401_s18, 1  ;;  %p123_p3 = scmp.ne.s32.totalorder %s573_s13, %s569_s12 }
   0x8   : > { %s738_s20 = smov (%p30_p0, %s28_s20), 0  ;;  %p124_p5 = scmp.eq.s32.totalorder %s402_s19, 1 }
   0x9   : > { %p651_p4 = por %p118_p2, %p117_p1  ;;  %s102_s23 = ssub.s32 %s585_s16, %s738_s20 }
   0xa   : > { %p405_p6 = scmp.ge.s32.totalorder %s589_s17, 1  ;;  %p105_p7 = scmp.eq.s32.totalorder %s102_s23, 0 }
   0xb   : > { %p658_p8 = por %p124_p5, %p123_p3  ;;  %p159_p9 = scmp.lt.s32.totalorder %s589_s17, 3 }
   0xc   : > { %s664_s25 = scalar_select %p105_p7, %s577_s14, %s107_s21  }
   0xd   : > { %p160_p10 = pnand %p405_p6, %p159_p9 }
   0xe   : > { %p186_p11 = scmp.lt.s32.totalorder (!%p160_p10), %s581_s15, 1  ;;  %s183_s21 = sand.u32 (!%p160_p10), 1, %s573_s13  }
   0xf   : > { %163 = sbr.rel (%p160_p10) target bundleno = 333 (0x14d), region = 32  ;;  %s442_s23 = sshll.u32 (!%p160_p10), %s581_s15, 3 }
  0x10   : > { %s322_s29 = scalar_lea.hbm (!%p160_p10), %s729_s3, %s442_s23  ;;  %s311_s8 = scalar_lea.sflag (!%p160_p10), [#allocation3], %s183_s21 }
  0x11   : > { %s326_s7 = sshll.u32 (!%p160_p10), %s322_s29, 4  ;;  %s531_s18 = scalar_lea.hbm (!%p160_p10), %s729_s3, 16  ;;  %s327_s7 = int_to_ptr.hbm [resolvable:$true] %s326_s7 }
  0x14   : > { %s187_s26 = scalar_select %p186_p11, %s581_s15, 1  ;;  %v212_v3 = vld [vmem:[%s727_s1 + $0x20] sm:$0xf]  ;;  %vm292_vm0 = vcmask 1043456   ;;  %v452_v7 = vld [vmem:[%s727_s1 + $0x18] sm:$0xff]  ;;  %v451_v8 = vld [vmem:[%s727_s1 + $0x10] sm:$0xff] }
  0x15   : > { %v278_v4 = vunpack.c.l.b16 %v212_v3  ;;  %v450_v10 = vld [vmem:[%s727_s1 + $0x8] sm:$0xff]  ;;  %v449_v11 = vld [vmem:[%s727_s1] sm:$0xff]  ;;  %vm288_vm1 = vcmask 588800   ;;  %s525_s15 = sshra.s32 %s327_s7, 4  ;;  %s526_s15 = int_to_ptr.hbm [resolvable:$true] %s525_s15 }
  0x16   : > { %s453_s27 = smul.u32 36, %s187_s26  ;;  %s406_s26 = sshll.u32 %s183_s21, 3  ;;  %v510_v16 = vld [vmem:[%s728_s2] ss:$0 sm:$0xff] }
  0x17   : > { %v283_v5 = vpack.c.b16 %v278_v4, %v278_v4  ;;  %s527_s9 = scalar_lea.hbm %s526_s15, 8  ;;  %p532_p1 = scmp.lt.s32.totalorder %s526_s15, %s729_s3 }
  0x18   : > { %s193_s30 = scalar_lea.vmem %s726_s0, %s453_s27  ;;  %p528_p12 = scmp.ne.s32.totalorder %s526_s15, %s527_s9 }
  0x19   : > { %v445_v0 = vld [vmem:[%s193_s30] sm:$0xff]  ;;  %v446_v1 = vld [vmem:[%s193_s30 + $0x8] sm:$0xff]  ;;  %v447_v2 = vld [vmem:[%s193_s30 + $0x10] sm:$0xff]  ;;  %v294_v6 = vsel %vm292_vm0, %v283_v5, 0  ;;  %p533_p2 = scmp.lt.s32.totalorder %s531_s18, %s527_s9 }
  0x1a   : > { %245 = vxpose.xlu0.c.b16.start [1/5] (short) (narrow) %v445_v0, 16  ;;  %299 = vmatpush.bf16.msra.mxu0 %v294_v6  ;;  %v448_v9 = vld [vmem:[%s193_s30 + $0x18] sm:$0xff]  ;;  %v203_v12 = vld [vmem:[%s193_s30 + $0x20] sm:$0xf]  ;;  %s185_s30 = scalar_lea.vmem [#allocation2], %s406_s26  ;;  %p529_p13 = pnand %p528_p12, %p651_p4 }
  0x1b   : > { %v234_v13 = vunpack.c.l.b16 %v203_v12  ;;  %s324_s6 = sshll.u32 %s185_s30, 4  ;;  %p534_p3 = por %p533_p2, %p532_p1  ;;  %s325_s6 = int_to_ptr.vmem [resolvable:$true] %s324_s6 }
  0x1c   : > { %p530_p0 = pneg %p529_p13 }
  0x1d   : > { %v239_v14 = vpack.c.b16 %v234_v13, %v234_v13 }
  0x1e   : > { %300 = vmatpush.bf16.msra.mxu0 %v452_v7  ;;  %p535_p5 = pnand %p534_p3, %p530_p0 }
  0x22   : > { %301 = vmatpush.bf16.msra.mxu0 %v451_v8 }
  0x26   : > { %302 = vmatpush.bf16.msra.mxu0 %v450_v10 }
  0x2a   : > { %246 = vxpose.xlu0.c.b16.cont [2/5] (short) (narrow) %v446_v1, 16  ;;  %303 = vmatpush.bf16.msra.mxu0 %v449_v11 }
  0x3a   : > { %247 = vxpose.xlu0.c.b16.cont [3/5] (short) (narrow) %v447_v2, 16 }
  0x4a   : > { %248 = vxpose.xlu0.c.b16.cont [4/5] (short) (narrow) %v448_v9, 16 }
  0x5a   : > { %249 = vxpose.xlu0.c.b16.end [5/5] (short) (narrow) %v239_v14, 16 }
  0xc6   : > { %v253_v15 = vpop.trf.xlu0 }
  0xc7   : > { %440 = vmatmul.msk.bf16.vlgmr.msra.gmra.mxu0 %vm288_vm1, %v253_v15 }
 0x144   : > { %v305_v17 = vpop.f32.mrf.mxu0 }
 0x145   : > { %v306_v18 = vadd.f32 %v510_v16, %v305_v17 }
 0x147   : > { %309 = vst [vmem:[%s185_s30] sm:$0xff] %v306_v18 }
 0x148   : > { %538 = shalt.err (!%p535_p5)
}
 0x149   : > { %454 = dma.vmem_to_hbm [thread:$0]  (%p651_p4), %s325_s6, 128, %s327_s7, %s311_s8  }
 0x14c   : > { %v307_v19 = vpop.f32.mrf.mxu0 }
 0x14d PF: > { %p460_p6 = scmp.ge.s32.totalorder %s589_s17, 2  ;;  %s338_s21 = sand.u32 1, %s569_s12  }
 0x14e   : > { %s339_s26 = scalar_lea.sflag [#allocation3], %s338_s21 }
 0x14f   : > { %p457_p7 = pnand %p460_p6, %p658_p8 }
 0x151   : > { %p458_p9 = pneg %p457_p7 }
 0x153   : > { %564 = dma.done.wait (%p458_p9), %s339_s26, 128  }
 0x154   : > { %566 = vsyncadd (%p458_p9), %s339_s26, 4294967168  ;;  %s16_s17 = sadd.s32 1, %s589_s17   ;;  %s732_s12 = smov %s573_s13 }
 0x155   : > { %p13_p10 = scmp.ge.s32.totalorder %s16_s17, 4   ;;  %s733_s13 = smov %s577_s14 }
 0x156   : > { %s734_s14 = smov %s664_s25  ;;  %s735_s15 = smov %s585_s16 }
 0x157   : > { %s736_s16 = smov %s738_s20  ;;  %15 = sbr.rel (!%p13_p10) target bundleno = 4 (0x4), region = 67 }
 0x15c   :  { %345 = vsyncpa [#allocation3], 1 }
 0x15d   :  { %347 = vsyncpa [#allocation3 + $0x1], 1 }

</bundles_post_ra>
